<compile_context>
chip_gen: v7x
topology: tpu7x:2x2x1
jax: 0.10.0
libtpu: 0.0.40
codegen_flags: <defaults>
</compile_context>

<pallas_src>
import functools

import jax
import jax.numpy as jnp
from jax import lax
from jax.experimental import pallas as pl
from jax.experimental.pallas import tpu as pltpu

_LANE = 128
_TILE_B_CAP = 2048  # sweepable; per-tile VMEM stays tiny for MLP-sized feature dims


def _round_up(x, m):
    return ((x + m - 1) // m) * m


def _choose_tile_b(b_pad, cap=_TILE_B_CAP):
    """Largest 128-multiple divisor of b_pad under `cap`.

    When b_pad > 128, force num_tiles >= 2 so the "parallel" grid axis actually spans
    both TensorCores on v7x (harmless extra ~0.35us step on v5e/v6e).
    """
    if b_pad <= _LANE:
        return b_pad
    limit = min(cap, b_pad // 2)
    best = _LANE
    t = _LANE
    while t <= limit:
        if b_pad % t == 0:
            best = t
        t += _LANE
    return best


def _apply_activation(h, activation):
    # h is feature-major (features, TILE_B); PyTorch's feature axis (dim=1) is axis 0 here.
    if activation == "relu":
        return jnp.maximum(h, 0.0)
    if activation == "sigmoid":
        return jax.nn.sigmoid(h)
    if activation == "tanh":
        return jnp.tanh(h)
    if activation == "softmax":
        m = jnp.max(h, axis=0, keepdims=True)
        e = jnp.exp(h - m)
        return e * pl.reciprocal(jnp.sum(e, axis=0, keepdims=True), approx=True)
    raise NotImplementedError(f"{activation} activation not implemented")


def _mlp_kernel(*refs, num_hidden_layers, activation):
    # refs = (x_ref, w0, b0, ..., w_{L-1}, b_{L-1}, w_head, b_head, o_ref)
    x_ref = refs[0]
    o_ref = refs[-1]
    p = refs[1:-1]

    # First layer: x block arrives batch-major (TILE_B, in). Contract the shared `in` axis
    # directly (A @ B^T); result is feature-major (out0, TILE_B) with batch on the lane axis.
    x_bf16 = x_ref[...].astype(jnp.bfloat16)
    w0 = p[0][...]                                   # (out0, in)  bf16 -> MXU LHS
    b0 = p[1][...]                                   # (out0, 1)   f32
    z = lax.dot_general(
        w0, x_bf16,
        dimension_numbers=(((1,), (1,)), ((), ())),
        preferred_element_type=jnp.float32,
    ) + b0
    h_f32 = _apply_activation(z, activation)         # keep elementwise math in f32 (v5e-safe)
    h_bf16 = h_f32.astype(jnp.bfloat16)

    for li in range(1, num_hidden_layers):
        w = p[2 * li][...]                           # (out, in) bf16
        b = p[2 * li + 1][...]                       # (out, 1)  f32
        z = jnp.dot(w, h_bf16, preferred_element_type=jnp.float32) + b
        h_f32 = _apply_activation(z, activation)
        h_bf16 = h_f32.astype(jnp.bfloat16)

    # Head (h_last -> 1): VPU multiply + cross-sublane (XLU) reduce; lane-dense (1, TILE_B).
    w_head = p[2 * num_hidden_layers][...]           # (h_last, 1) f32
    b_head = p[2 * num_hidden_layers + 1][...]       # (1, 1)      f32
    out = jnp.sum(h_f32 * w_head, axis=0, keepdims=True) + b_head
    o_ref[...] = out.astype(o_ref.dtype)


def base_learner_regression_forward(x, params, activation, tile_b=None):
    """params: list of (W, b) in PyTorch nn.Linear layout: W (out, in), b (out,)."""
    batch, in_features = x.shape
    num_hidden_layers = len(params) - 1              # last (W, b) is the (h_last -> 1) head

    if batch == 0:                                   # degenerate edge case
        return jnp.zeros((0,), jnp.float32)

    b_pad = _round_up(batch, _LANE)
    if tile_b is None:
        tile_b = _choose_tile_b(b_pad)
    assert b_pad % tile_b == 0
    num_tiles = b_pad // tile_b

    # No wrapper transpose. Pad only to a 128 multiple; pad in bf16 when needed, otherwise
    # pass f32 straight through (fewest total HBM bytes) and cast inside the kernel.
    if b_pad == batch:
        x_in = x
    else:
        x_in = jnp.zeros((b_pad, in_features), jnp.bfloat16).at[:batch].set(
            x.astype(jnp.bfloat16))

    inputs = [x_in]
    in_specs = [pl.BlockSpec((tile_b, in_features), lambda i: (i, 0))]

    # Hidden layers: bf16 weights (MXU), f32 column biases. Constant index maps -> resident.
    for w, b in params[:-1]:
        w_bf = w.astype(jnp.bfloat16)                      # (out, in)
        b_col = b.reshape(-1, 1).astype(jnp.float32)       # (out, 1)
        inputs += [w_bf, b_col]
        in_specs += [
            pl.BlockSpec(w_bf.shape, lambda i: (0, 0)),
            pl.BlockSpec(b_col.shape, lambda i: (0, 0)),
        ]

    # Head weights stay f32 (used on the VPU, not the MXU).
    w_out, b_out = params[-1]
    w_head = w_out.reshape(-1, 1).astype(jnp.float32)       # (h_last, 1)
    b_head = b_out.reshape(1, 1).astype(jnp.float32)        # (1, 1)
    inputs += [w_head, b_head]
    in_specs += [
        pl.BlockSpec(w_head.shape, lambda i: (0, 0)),
        pl.BlockSpec((1, 1), lambda i: (0, 0)),
    ]

    kernel = functools.partial(
        _mlp_kernel, num_hidden_layers=num_hidden_layers, activation=activation)

    # VMEM budget from actual buffer sizes (double-buffered I/O blocks + params + slack),
    # capped at 48 MiB so it stays safe on v7x's 64 MiB VMEM.
    x_block_bytes = tile_b * in_features * x_in.dtype.itemsize
    out_block_bytes = tile_b * 4
    param_bytes = sum(int(a.size) * a.dtype.itemsize for a in inputs[1:])
    vmem_limit = int(min(
        max(2 * (x_block_bytes + out_block_bytes) + 2 * param_bytes + (4 << 20), 16 << 20),
        48 << 20))

    flops = 2 * b_pad * sum(int(w.size) for w, _ in params)
    transcendentals = (0 if activation == "relu"
                       else b_pad * sum(int(w.shape[0]) for w, _ in params[:-1]))
    bytes_accessed = (sum(int(a.size) * a.dtype.itemsize for a in inputs) + b_pad * 4)

    out = pl.pallas_call(
        kernel,
        out_shape=jax.ShapeDtypeStruct((1, b_pad), jnp.float32),
        grid=(num_tiles,),
        in_specs=in_specs,
        out_specs=pl.BlockSpec((1, tile_b), lambda i: (0, i)),
        compiler_params=pltpu.CompilerParams(
            dimension_semantics=("parallel",),
            vmem_limit_bytes=vmem_limit,
        ),
        cost_estimate=pl.CostEstimate(
            flops=flops,
            transcendentals=transcendentals,
            bytes_accessed=bytes_accessed,
        ),
    )(*inputs)

    # PyTorch .squeeze(): (batch, 1) -> (batch,) (and to a scalar when batch == 1).
    return jnp.squeeze(out[0, :batch])


def init_params(key, input_size, hidden_sizes):
    """PyTorch nn.Linear-style uniform init; W stored (out, in), b stored (out,)."""
    sizes = [input_size] + list(hidden_sizes) + [1]
    params = []
    for i in range(len(sizes) - 1):
        fan_in, fan_out = sizes[i], sizes[i + 1]
        key, kw, kb = jax.random.split(key, 3)
        bound = 1.0 / float(fan_in) ** 0.5
        w = jax.random.uniform(kw, (fan_out, fan_in), jnp.float32,
                               minval=-bound, maxval=bound)
        b = jax.random.uniform(kb, (fan_out,), jnp.float32,
                               minval=-bound, maxval=bound)
        params.append((w, b))
    return params


def reference_forward(x, params, activation):
    h = x
    for i, (w, b) in enumerate(params):
        h = h @ w.T + b
        if i < len(params) - 1:
            if activation == "relu":
                h = jnp.maximum(h, 0.0)
            elif activation == "sigmoid":
                h = jax.nn.sigmoid(h)
            elif activation == "tanh":
                h = jnp.tanh(h)
            elif activation == "softmax":
                h = jax.nn.softmax(h, axis=1)
    return jnp.squeeze(h)


if __name__ == "__main__":
    key = jax.random.PRNGKey(0)
    input_size = 16

    # Case 1: small batch (8 -> padded to 128, single tile, bf16 pad path), relu.
    batch1, hidden1, act1 = 8, [32, 32], "relu"
    key, kx1, kp1 = jax.random.split(key, 3)
    x1 = jax.random.normal(kx1, (batch1, input_size), jnp.float32)
    params1 = init_params(kp1, input_size, hidden1)
    out1 = jax.block_until_ready(base_learner_regression_forward(x1, params1, act1))
    ref1 = reference_forward(x1, params1, act1)
    assert out1.shape == (batch1,), out1.shape
    # bf16 MXU operands with f32 accumulation -> loose tolerance vs the pure-f32 reference.
    assert jnp.allclose(out1, ref1, atol=3e-2, rtol=3e-2), (out1, ref1)

    # Case 2: batch already a 128-multiple (no pad, f32 straight-through, 2-tile grid), tanh.
    batch2, hidden2, act2 = 256, [32], "tanh"
    key, kx2, kp2 = jax.random.split(key, 3)
    x2 = jax.random.normal(kx2, (batch2, input_size), jnp.float32)
    params2 = init_params(kp2, input_size, hidden2)
    out2 = jax.block_until_ready(base_learner_regression_forward(x2, params2, act2))
    ref2 = reference_forward(x2, params2, act2)
    assert out2.shape == (batch2,), out2.shape
    assert jnp.allclose(out2, ref2, atol=3e-2, rtol=3e-2), (out2, ref2)

    print("KERNEL_OK")
</pallas_src>

<mosaic_0001>
module attributes {stable_mosaic.version = 11 : i64} {
  func.func @_mlp_kernel(%arg0: i32, %arg1: memref<128x16xbf16, #tpu.memory_space<vmem>>, %arg2: memref<32x16xbf16, #tpu.memory_space<vmem>>, %arg3: memref<32x1xf32, #tpu.memory_space<vmem>>, %arg4: memref<32x32xbf16, #tpu.memory_space<vmem>>, %arg5: memref<32x1xf32, #tpu.memory_space<vmem>>, %arg6: memref<32x1xf32, #tpu.memory_space<vmem>>, %arg7: memref<1x1xf32, #tpu.memory_space<vmem>>, %arg8: memref<1x128xf32, #tpu.memory_space<vmem>>) attributes {dimension_semantics = [#tpu.dimension_semantics<parallel>], iteration_bounds = array<i64: 1>, scalar_prefetch = 0 : i64, scratch_operands = 0 : i64, tpu.core_type = #tpu.core_type<tc>, window_params = [{transform_indices = @transform_0, window_bounds = array<i64: 128, 16>}, {pipeline_mode = #tpu.pipeline_mode<synchronous>, transform_indices = @transform_1, window_bounds = array<i64: 32, 16>}, {pipeline_mode = #tpu.pipeline_mode<synchronous>, transform_indices = @transform_2, window_bounds = array<i64: 32, 1>}, {pipeline_mode = #tpu.pipeline_mode<synchronous>, transform_indices = @transform_3, window_bounds = array<i64: 32, 32>}, {pipeline_mode = #tpu.pipeline_mode<synchronous>, transform_indices = @transform_4, window_bounds = array<i64: 32, 1>}, {pipeline_mode = #tpu.pipeline_mode<synchronous>, transform_indices = @transform_5, window_bounds = array<i64: 32, 1>}, {pipeline_mode = #tpu.pipeline_mode<synchronous>, transform_indices = @transform_6, window_bounds = array<i64: 1, 1>}, {transform_indices = @transform_7, window_bounds = array<i64: 1, 128>}]} {
    %c0 = arith.constant 0 : index
    %c0_0 = arith.constant 0 : index
    %0 = vector.load %arg1[%c0, %c0_0] : memref<128x16xbf16, #tpu.memory_space<vmem>>, vector<128x16xbf16>
    %c0_1 = arith.constant 0 : index
    %c0_2 = arith.constant 0 : index
    %1 = vector.load %arg2[%c0_1, %c0_2] : memref<32x16xbf16, #tpu.memory_space<vmem>>, vector<32x16xbf16>
    %c0_3 = arith.constant 0 : index
    %c0_4 = arith.constant 0 : index
    %2 = vector.load %arg3[%c0_3, %c0_4] : memref<32x1xf32, #tpu.memory_space<vmem>>, vector<32x1xf32>
    %cst = arith.constant dense<0.000000e+00> : vector<32x128xf32>
    %3 = tpu.matmul %1, %0, %cst {dimension_numbers = #tpu.dot_dimension_numbers<[1], [1], [0], [0], [0, 0, 1, 0], [], []>} : vector<32x16xbf16>, vector<128x16xbf16>, vector<32x128xf32> -> vector<32x128xf32>
    %4 = vector.broadcast %2 : vector<32x1xf32> to vector<32x128xf32>
    %5 = arith.addf %3, %4 : vector<32x128xf32>
    %cst_5 = arith.constant 0.000000e+00 : f32
    %6 = vector.broadcast %cst_5 : f32 to vector<32x128xf32>
    %7 = arith.maximumf %5, %6 : vector<32x128xf32>
    %8 = arith.truncf %7 : vector<32x128xf32> to vector<32x128xbf16>
    %c0_6 = arith.constant 0 : index
    %c0_7 = arith.constant 0 : index
    %9 = vector.load %arg4[%c0_6, %c0_7] : memref<32x32xbf16, #tpu.memory_space<vmem>>, vector<32x32xbf16>
    %c0_8 = arith.constant 0 : index
    %c0_9 = arith.constant 0 : index
    %10 = vector.load %arg5[%c0_8, %c0_9] : memref<32x1xf32, #tpu.memory_space<vmem>>, vector<32x1xf32>
    %cst_10 = arith.constant dense<0.000000e+00> : vector<32x128xf32>
    %11 = tpu.matmul %9, %8, %cst_10 {dimension_numbers = #tpu.dot_dimension_numbers<[1], [0], [0], [1], [0, 0, 1, 1], [], []>} : vector<32x32xbf16>, vector<32x128xbf16>, vector<32x128xf32> -> vector<32x128xf32>
    %12 = vector.broadcast %10 : vector<32x1xf32> to vector<32x128xf32>
    %13 = arith.addf %11, %12 : vector<32x128xf32>
    %cst_11 = arith.constant 0.000000e+00 : f32
    %14 = vector.broadcast %cst_11 : f32 to vector<32x128xf32>
    %15 = arith.maximumf %13, %14 : vector<32x128xf32>
    %c0_12 = arith.constant 0 : index
    %c0_13 = arith.constant 0 : index
    %16 = vector.load %arg6[%c0_12, %c0_13] : memref<32x1xf32, #tpu.memory_space<vmem>>, vector<32x1xf32>
    %c0_14 = arith.constant 0 : index
    %c0_15 = arith.constant 0 : index
    %17 = vector.load %arg7[%c0_14, %c0_15] : memref<1x1xf32, #tpu.memory_space<vmem>>, vector<1x1xf32>
    %18 = vector.broadcast %16 : vector<32x1xf32> to vector<32x128xf32>
    %19 = arith.mulf %15, %18 : vector<32x128xf32>
    %cst_16 = arith.constant dense<0.000000e+00> : vector<128xf32>
    %20 = vector.multi_reduction <add>, %19, %cst_16 [0] : vector<32x128xf32> to vector<128xf32>
    %21 = vector.shape_cast %20 : vector<128xf32> to vector<1x128xf32>
    %22 = vector.broadcast %17 : vector<1x1xf32> to vector<1x128xf32>
    %23 = arith.addf %21, %22 : vector<1x128xf32>
    %c0_17 = arith.constant 0 : index
    %c0_18 = arith.constant 0 : index
    %24 = vector.load %arg8[%c0_17, %c0_18] : memref<1x128xf32, #tpu.memory_space<vmem>>, vector<1x128xf32>
    tpu.vector_store %arg8[%c0_17, %c0_18], %23 {strides = array<i32>} : memref<1x128xf32, #tpu.memory_space<vmem>>, vector<1x128xf32>,
    return
  }
  func.func @transform_0(%arg0: i32) -> (i32, i32) {
    %c0_i32 = arith.constant 0 : i32
    %c0_i32_0 = arith.constant 0 : i32
    return %arg0, %c0_i32 : i32, i32
  }
  func.func @transform_1(%arg0: i32) -> (i32, i32) {
    %c0_i32 = arith.constant 0 : i32
    %c0_i32_0 = arith.constant 0 : i32
    %c0_i32_1 = arith.constant 0 : i32
    return %c0_i32, %c0_i32_0 : i32, i32
  }
  func.func @transform_2(%arg0: i32) -> (i32, i32) {
    %c0_i32 = arith.constant 0 : i32
    %c0_i32_0 = arith.constant 0 : i32
    %c0_i32_1 = arith.constant 0 : i32
    return %c0_i32, %c0_i32_0 : i32, i32
  }
  func.func @transform_3(%arg0: i32) -> (i32, i32) {
    %c0_i32 = arith.constant 0 : i32
    %c0_i32_0 = arith.constant 0 : i32
    %c0_i32_1 = arith.constant 0 : i32
    return %c0_i32, %c0_i32_0 : i32, i32
  }
  func.func @transform_4(%arg0: i32) -> (i32, i32) {
    %c0_i32 = arith.constant 0 : i32
    %c0_i32_0 = arith.constant 0 : i32
    %c0_i32_1 = arith.constant 0 : i32
    return %c0_i32, %c0_i32_0 : i32, i32
  }
  func.func @transform_5(%arg0: i32) -> (i32, i32) {
    %c0_i32 = arith.constant 0 : i32
    %c0_i32_0 = arith.constant 0 : i32
    %c0_i32_1 = arith.constant 0 : i32
    return %c0_i32, %c0_i32_0 : i32, i32
  }
  func.func @transform_6(%arg0: i32) -> (i32, i32) {
    %c0_i32 = arith.constant 0 : i32
    %c0_i32_0 = arith.constant 0 : i32
    %c0_i32_1 = arith.constant 0 : i32
    return %c0_i32, %c0_i32_0 : i32, i32
  }
  func.func @transform_7(%arg0: i32) -> (i32, i32) {
    %c0_i32 = arith.constant 0 : i32
    %c0_i32_0 = arith.constant 0 : i32
    return %c0_i32, %arg0 : i32, i32
  }
}

</mosaic_0001>

<bundles_post_ra>
// kernel: tpu_custom_call.1
= control target key start
LH: loop header
LB: loop body
LE: loop exit
PB: predicated region body
PF: predicated region fallthrough
CT: control target
= control target key end

     0   :  { %s626_s0 = inlined_call_operand.vmem [shape: bf16[128,16], index: 0, kind: input, shape index: {}]   ;;  %s627_s1 = inlined_call_operand.vmem [shape: bf16[32,16], index: 1, kind: input, shape index: {}]   ;;  %s628_s2 = inlined_call_operand.vmem [shape: f32[32,1], index: 2, kind: input, shape index: {}]   ;;  %s629_s3 = inlined_call_operand.vmem [shape: bf16[32,32], index: 3, kind: input, shape index: {}]   ;;  %s630_s4 = inlined_call_operand.vmem [shape: f32[32,1], index: 4, kind: input, shape index: {}]   ;;  %s631_s5 = inlined_call_operand.vmem [shape: f32[32,1], index: 5, kind: input, shape index: {}]   ;;  %s632_s6 = inlined_call_operand.<no memory space> [shape: f32[1,1], index: 6, kind: input, shape index: {}]   ;;  %s633_s7 = inlined_call_operand.hbm [shape: f32[1,128], index: 7, kind: output, shape index: {}]  }
   0x1   :  { %v12_v0 = vstv %s632_s6 }
   0x2   :  { %13 = vst [vmem:[#allocation2] sm:$0x1] %v12_v0 }
   0x3   :  { %v441_v1 = vld [vmem:[%s626_s0] sm:$0xff]   ;;  %vm124_vm0 = vcmask 130048   ;;  %v442_v2 = vld [vmem:[%s626_s0 + $0x8] sm:$0xff]   ;;  %v477_v4 = vmov 0   ;;  %v443_v5 = vld [vmem:[%s626_s0 + $0x10] sm:$0xff]  }
   0x4   :  { %429 = vmatprep.subr.msk.bf16.mxu0 %vm124_vm0, %v441_v1  ;;  %v132_v3 = vsel %vm124_vm0, %v441_v1, 0  ;;  %439 = vset.pattern.permute.xlu0 %v477_v4  ;;  %v135_v6 = vsel %vm124_vm0, %v442_v2, 0  ;;  %v449_v7 = vld [vmem:[%s627_s1] sm:$0xff]   ;;  %v52_v9 = vld [vmem:[%s628_s2 + $0x10] sm:$0xff]  ;;  %v51_v10 = vld [vmem:[%s628_s2 + $0x8] sm:$0xff] }
   0x5   :  { %402 = vmatpush3.bf16.xpose.msra.mxu0 %v132_v3  ;;  %440 = vset.pattern.permute.xlu1 %v477_v4  ;;  %v50_v8 = vld [vmem:[%s628_s2] sm:$0xff]  ;;  %v53_v11 = vld [vmem:[%s628_s2 + $0x18] sm:$0xff] }
   0x6   :  { %430 = vmatprep.subr.msk.bf16.mxu0 %vm124_vm0, %v442_v2  ;;  %417 = vmatprep.mubr.msk.bf16.mxu0 %vm124_vm0, %v449_v7 }
   0x7   :  { %56 = vperm.xlu0 %439, %v50_v8   ;;  %66 = vperm.xlu1 %440, %v52_v9  }
   0xb   :  { %61 = vperm.xlu0 %439, %v51_v10  }
   0xd   :  { %404 = vmatpush3.bf16.xpose.msra.mxu0 %v135_v6 }
   0xe   :  { %431 = vmatprep.subr.msk.bf16.mxu0 %vm124_vm0, %v443_v5 }
   0xf   :  { %14 = vsyncpa [#allocation4], 0  ;;  %v138_v12 = vsel %vm124_vm0, %v443_v5, 0  ;;  %v444_v13 = vld [vmem:[%s626_s0 + $0x18] sm:$0xff]   ;;  %v214_v14 = vld [vmem:[%s630_s4] sm:$0xff]  ;;  %71 = vperm.xlu1 %440, %v53_v11   ;;  %vm248_vm1 = vcmask 261120  }
  0x10   :  { %v215_v15 = vld [vmem:[%s630_s4 + $0x8] sm:$0xff]  ;;  %220 = vperm.xlu0 %439, %v214_v14   ;;  %v216_v16 = vld [vmem:[%s630_s4 + $0x10] sm:$0xff]  ;;  %v217_v17 = vld [vmem:[%s630_s4 + $0x18] sm:$0xff]  ;;  %v141_v18 = vsel %vm124_vm0, %v444_v13, 0 }
  0x11   :  { %v445_v19 = vld [vmem:[%s626_s0 + $0x20] sm:$0xff]   ;;  %v309_v21 = vld [vmem:[%s631_s5 + $0x8] sm:$0xff]  ;;  %v310_v22 = vld [vmem:[%s631_s5 + $0x10] sm:$0xff] }
  0x12   :  { %v308_v20 = vld [vmem:[%s631_s5] sm:$0xff]  ;;  %v311_v23 = vld [vmem:[%s631_s5 + $0x18] sm:$0xff]  ;;  %v144_v24 = vsel %vm124_vm0, %v445_v19, 0  ;;  %v446_v25 = vld [vmem:[%s626_s0 + $0x28] sm:$0xff]  }
  0x13   :  { %225 = vperm.xlu1 %440, %v215_v15   ;;  %v312_v26 = vld [vmem:[#allocation2] sm:$0x1]  ;;  %v147_v27 = vsel %vm124_vm0, %v446_v25, 0  ;;  %v447_v28 = vld [vmem:[%s626_s0 + $0x30] sm:$0xff]   ;;  %v448_v30 = vld [vmem:[%s626_s0 + $0x38] sm:$0xff]   ;;  %v351_v15 = vlaneseq }
  0x14   :  { %230 = vperm.xlu0 %439, %v216_v16   ;;  %v150_v29 = vsel %vm124_vm0, %v447_v28, 0  ;;  %v153_v31 = vsel %vm124_vm0, %v448_v30, 0  ;;  %v450_v32 = vld [vmem:[%s627_s1 + $0x8] sm:$0xff]   ;;  %v451_v33 = vld [vmem:[%s629_s3] sm:$0xff]  }
  0x15   :  { %406 = vmatpush3.bf16.xpose.msra.mxu0 %v138_v12  ;;  %425 = vmatprep.mubr.msk.bf16.mxu1 %vm248_vm1, %v451_v33  ;;  %v452_v52 = vld [vmem:[%s629_s3 + $0x8] sm:$0xff]   ;;  %s478_s3 = smov [#allocation3]  }
  0x16   :  { %432 = vmatprep.subr.msk.bf16.mxu0 %vm124_vm0, %v444_v13  ;;  %s363_s21 = sshll.u32 %s478_s3, 4  ;;  %s364_s21 = int_to_ptr.vmem [resolvable:$true] %s363_s21 }
  0x17   :  { %235 = vperm.xlu1 %440, %v217_v17   ;;  %s453_s22 = scalar_lea.vmem %s364_s21, 16  ;;  %s457_s23 = scalar_lea.vmem %s364_s21, 32 }
  0x18   :  { %315 = vperm.xlu0 %439, %v308_v20   ;;  %p454_p0 = scmp.ne.s32.totalorder %s364_s21, %s453_s22  ;;  %p458_p1 = scmp.lt.s32.totalorder %s364_s21, %s364_s21 }
  0x19   :  { %p459_p2 = scmp.lt.s32.totalorder %s457_s23, %s453_s22 }
  0x1b   :  { %320 = vperm.xlu1 %440, %v309_v21   ;;  %p460_p3 = por %p459_p2, %p458_p1 }
  0x1c   :  { %325 = vperm.xlu0 %439, %v310_v22  }
  0x1d   :  { %408 = vmatpush3.bf16.xpose.msra.mxu0 %v141_v18  ;;  %v352_v18 = vshrl.u32 %v351_v15, 7  ;;  %p461_p4 = pnand %p460_p3, %p454_p0 }
  0x1e   :  { %433 = vmatprep.subr.msk.bf16.mxu0 %vm124_vm0, %v445_v19 }
  0x1f   :  { %330 = vperm.xlu1 %440, %v311_v23   ;;  %v353_v21 = vsub.s32 0, %v352_v18 }
  0x20   :  { %348 = vperm.xlu0 %439, %v312_v26  }
  0x25   :  { %410 = vmatpush3.bf16.xpose.msra.mxu0 %v144_v24 }
  0x26   :  { %434 = vmatprep.subr.msk.bf16.mxu0 %vm124_vm0, %v446_v25 }
  0x2d   :  { %412 = vmatpush3.bf16.xpose.msra.mxu0 %v147_v27 }
  0x2e   :  { %435 = vmatprep.subr.msk.bf16.mxu0 %vm124_vm0, %v447_v28 }
  0x35   :  { %414 = vmatpush3.bf16.xpose.msra.mxu0 %v150_v29 }
  0x36   :  { %436 = vmatprep.subr.msk.bf16.mxu0 %vm124_vm0, %v448_v30 }
  0x3d   :  { %416 = vmatpush3.bf16.xpose.msra.mxu0 %v153_v31 }
  0x44   :  { %418 = vmatmul.mubr.msk.bf16.vlgmr.msra.gmra.mrb[0].mxu0 %vm124_vm0, %v450_v32 }
  0x86   :  { %v67_v34 = vpop.permute.xlu1 %66  ;;  %v57_v35 = vpop.permute.xlu0 %56 }
  0x8a   :  { %v62_v42 = vpop.permute.xlu0 %61 }
  0x8e   :  { %v72_v39 = vpop.permute.xlu1 %71 }
  0x8f   :  { %v221_v53 = vpop.permute.xlu0 %220 }
  0x92   :  { %v226_v54 = vpop.permute.xlu1 %225 }
  0x93   :  { %v231_v55 = vpop.permute.xlu0 %230 }
  0x96   :  { %v236_v56 = vpop.permute.xlu1 %235 }
  0x97   :  { %v316_v62 = vpop.permute.xlu0 %315 }
  0x9a   :  { %v321_v3 = vpop.permute.xlu1 %320 }
  0x9b   :  { %v326_v9 = vpop.permute.xlu0 %325 }
  0x9e   :  { %v331_v12 = vpop.permute.xlu1 %330 }
  0x9f   :  { %v349_v23 = vpop.permute.xlu0 %348 }
  0xa0   :  { %v354_v25 = vrot.slane %v349_v23, %v353_v21 }
 0x117   :  { %v419_v36 = vpop.f32.mrb[0].mxu0 }
 0x118   :  { %v198_v37 = vadd.f32 %v419_v36, %v67_v34  ;;  %v189_v38 = vpop.f32.mrb[1].mxu0 }
 0x119   :  { %v190_v40 = vadd.f32 %v189_v38, %v57_v35  ;;  %v420_v41 = vpop.f32.mrb[2].mxu0 }
 0x11a   :  { %v201_v43 = vadd.f32 %v420_v41, %v72_v39  ;;  %v192_v44 = vpop.f32.mrb[3].mxu0  ;;  %v206_v46 = vmax.f32 %v198_v37, 0.0 }
 0x11b   :  { %v193_v45 = vadd.f32 %v192_v44, %v62_v42  ;;  %v204_v48 = vmax.f32 %v190_v40, 0.0 }
 0x11c   :  { %v207_v47 = vmax.f32 %v201_v43, 0.0 }
 0x11d   :  { %v205_v49 = vmax.f32 %v193_v45, 0.0 }
 0x11e   :  { %v209_v50 = vpack.c.bf16 %v207_v47, %v206_v46 }
 0x11f   :  { %v208_v51 = vpack.c.bf16 %v205_v49, %v204_v48 }
 0x121   :  { %421 = vmatprep.subr.bf16.mxu1 %v208_v51 }
 0x122   :  { %422 = vmatpush3.bf16.msra.mxu1 %v208_v51 }
 0x123   :  { %423 = vmatprep.subr.bf16.mxu1 %v209_v50 }
 0x126   :  { %424 = vmatpush3.bf16.msra.mxu1 %v209_v50 }
 0x129   :  { %426 = vmatmul.mubr.msk.bf16.vlgmr.msra.gmra.mrb[0].mxu1 %vm248_vm1, %v452_v52 }
 0x1fc   :  { %v427_v57 = vpop.f32.mrb[0].mxu1 }
 0x1fd   :  { %v289_v58 = vpop.f32.mrb[1].mxu1  ;;  %v298_v59 = vadd.f32 %v427_v57, %v231_v55 }
 0x1fe   :  { %v290_v60 = vadd.f32 %v289_v58, %v221_v53  ;;  %v428_v61 = vpop.f32.mrb[2].mxu1 }
 0x1ff   :  { %v292_v63 = vpop.f32.mrb[3].mxu1  ;;  %v301_v1 = vadd.f32 %v428_v61, %v236_v56  ;;  %v306_v4 = vmax.f32 %v298_v59, 0.0 }
 0x200   :  { %v304_v0 = vmax.f32 %v290_v60, 0.0  ;;  %v293_v2 = vadd.f32 %v292_v63, %v226_v54 }
 0x201   :  { %v307_v7 = vmax.f32 %v301_v1, 0.0  ;;  %v335_v10 = vmul.f32 %v326_v9, %v306_v4 }
 0x202   :  { %v305_v5 = vmax.f32 %v293_v2, 0.0  ;;  %v333_v6 = vmul.f32 %v316_v62, %v304_v0 }
 0x203   :  { %v336_v13 = vmul.f32 %v331_v12, %v307_v7 }
 0x204   :  { %v334_v8 = vmul.f32 %v321_v3, %v305_v5 }
 0x206   :  { %v337_v11 = vadd.f32 %v334_v8, %v333_v6 }
 0x208   :  { %v338_v14 = vadd.f32 %v337_v11, %v335_v10 }
 0x20a   :  { %v339_v16 = vadd.f32 %v338_v14, %v336_v13 }
 0x20c   :  { %v340_v17 = vrot.slane %v339_v16, 4 }
 0x20e   :  { %v341_v19 = vadd.f32 %v340_v17, %v339_v16 }
 0x210   :  { %v342_v20 = vrot.slane %v341_v19, 2 }
 0x212   :  { %v343_v22 = vadd.f32 %v342_v20, %v341_v19 }
 0x214   :  { %v344_v24 = vrot.slane %v343_v22, 1 }
 0x216   :  { %v345_v26 = vadd.f32 %v344_v24, %v343_v22 }
 0x218   :  { %v355_v27 = vadd.f32 %v354_v25, %v345_v26 }
 0x21a   :  { %356 = vst [vmem:[#allocation3] sm:$0x1] %v355_v27 }
 0x21b   :  { %464 = shalt.err (!%p461_p4)
}
 0x21c   :  { %s465_s25 = scalar_lea.hbm %s633_s7, 16 }
 0x21d   :  { %p466_p5 = scmp.ne.s32.totalorder %s633_s7, %s465_s25  ;;  %p469_p6 = scmp.lt.u32.totalorder %s465_s25, %s633_s7 }
 0x21f   :  { %p471_p7 = pnand %p469_p6, %p466_p5 }
 0x221   :  { %474 = shalt.err (!%p471_p7)
}
 0x222   :  { %366 = dma.vmem_to_hbm [thread:$0]  %s364_s21, 16, %s633_s7, [#allocation4]  }
 0x223   :  { %475 = dma.done.wait [#allocation4], 16  }
 0x224   :  { %476 = vsyncadd [#allocation4], 4294967280 }
 0x225   :  { %370 = vsyncpa [#allocation4], 1 }

</bundles_post_ra>
